<compile_context>
chip_gen: v5e
topology: v5e:2x2
jax: 0.10.0
libtpu: 0.0.40
codegen_flags: <defaults>
</compile_context>

<pallas_src>
import jax
import jax.numpy as jnp
from jax.experimental import pallas as pl
from jax.experimental.pallas import tpu as pltpu


def _quantile_loss_kernel(preds_ref, target_ref, quant_ref, o_ref):
    """One lane-dense (Q, TB) tile of the pinball loss, accumulated into o_ref.

    preds_ref : (Q, TB)    VMEM  -- quantile on sublanes, batch on lanes
    target_ref: (1, TB)    VMEM  -- broadcast over sublanes
    quant_ref : (Q, 1)     VMEM  -- broadcast over lanes
    o_ref     : (1, Q, TB) VMEM  -- per-core running partial sums (accumulator)
    """
    i = pl.program_id(1)

    @pl.when(i == 0)
    def _init():
        o_ref[...] = jnp.zeros_like(o_ref)

    preds = preds_ref[...]                                   # (Q, TB)
    target = target_ref[...]                                 # (1, TB)
    q = quant_ref[...]                                       # (Q, 1)

    errors = target - preds                                  # (Q, TB)
    pinball = jnp.maximum((q - 1.0) * errors, q * errors)    # (Q, TB), pure VPU

    o_ref[...] += pinball[None, :, :]                        # keep per-lane partials


def quantile_loss(preds, target, quantiles, *, max_tile=32768, num_cores=2):
    """preds: (B, Q), target: (B,), quantiles: (Q,) -> scalar f32 loss."""
    preds = jnp.asarray(preds, jnp.float32)
    target = jnp.asarray(target, jnp.float32)
    q = jnp.asarray(quantiles, jnp.float32)

    B, Q = preds.shape
    assert target.shape == (B,)
    assert q.shape == (Q,)

    # Tile sizing: split the batch into `num_cores` slices (v7x megacore), each
    # processed as n_per_core lane-dense tiles of width tb (multiple of 128).
    n_per_core = max(1, pl.cdiv(B, num_cores * max_tile))
    tb = max(128, 128 * pl.cdiv(pl.cdiv(B, num_cores * n_per_core), 128))
    tb = min(tb, max_tile)
    b_pad = num_cores * n_per_core * tb

    # Lane-dense layout + zero padding (zero rows contribute zero loss).
    preds_t = jnp.pad(preds.T, ((0, 0), (0, b_pad - B)))            # (Q, B_pad)
    target_p = jnp.pad(target, (0, b_pad - B)).reshape(1, b_pad)    # (1, B_pad)
    quant2d = q.reshape(Q, 1)                                       # (Q, 1)

    partials = pl.pallas_call(
        _quantile_loss_kernel,
        out_shape=jax.ShapeDtypeStruct((num_cores, Q, tb), jnp.float32),
        grid_spec=pltpu.PrefetchScalarGridSpec(
            num_scalar_prefetch=0,
            grid=(num_cores, n_per_core),
            in_specs=[
                pl.BlockSpec((Q, tb), lambda c, i: (0, c * n_per_core + i)),
                pl.BlockSpec((1, tb), lambda c, i: (0, c * n_per_core + i)),
                pl.BlockSpec((Q, 1), lambda c, i: (0, 0)),
            ],
            out_specs=pl.BlockSpec((1, Q, tb), lambda c, i: (c, 0, 0)),
        ),
        compiler_params=pltpu.CompilerParams(
            dimension_semantics=("parallel", "arbitrary"),
        ),
    )(preds_t, target_p, quant2d)

    # Tiny final cross-lane reduction + mean over the TRUE batch size.
    return jnp.sum(partials) / jnp.float32(B)


def quantile_loss_ref(preds, target, quantiles):
    """Pure-JAX reference mirroring the PyTorch forward."""
    losses = []
    for i, q in enumerate(quantiles):
        errors = target - preds[:, i]
        losses.append(jnp.maximum((q - 1.0) * errors, q * errors)[:, None])
    return jnp.mean(jnp.sum(jnp.concatenate(losses, axis=1), axis=1))


if __name__ == "__main__":
    quantiles = (0.1, 0.5, 0.9)

    # Small test case (matches the module's expected input layout).
    B, Q = 8, len(quantiles)
    key = jax.random.PRNGKey(0)
    k_preds, k_target, k2p, k2t = jax.random.split(key, 4)
    preds = jax.random.normal(k_preds, (B, Q), dtype=jnp.float32)
    target = jax.random.normal(k_target, (B,), dtype=jnp.float32)

    loss = jax.block_until_ready(quantile_loss(preds, target, quantiles))
    ref = jax.block_until_ready(quantile_loss_ref(preds, target, quantiles))
    assert jnp.allclose(loss, ref, rtol=1e-5, atol=1e-5), (loss, ref)

    # Second case: odd batch size + forced small tile to exercise padding and
    # the multi-step accumulator path of the grid.
    B2 = 300
    preds2 = jax.random.normal(k2p, (B2, Q), dtype=jnp.float32)
    target2 = jax.random.normal(k2t, (B2,), dtype=jnp.float32)
    loss2 = jax.block_until_ready(
        quantile_loss(preds2, target2, quantiles, max_tile=128)
    )
    ref2 = jax.block_until_ready(quantile_loss_ref(preds2, target2, quantiles))
    assert jnp.allclose(loss2, ref2, rtol=1e-5, atol=1e-5), (loss2, ref2)

    print("KERNEL_OK")
</pallas_src>

<mosaic_0001>
module attributes {stable_mosaic.version = 11 : i64} {
  func.func @_quantile_loss_kernel(%arg0: i32, %arg1: i32, %arg2: memref<3x128xf32, #tpu.memory_space<vmem>>, %arg3: memref<1x128xf32, #tpu.memory_space<vmem>>, %arg4: memref<3x1xf32, #tpu.memory_space<vmem>>, %arg5: memref<1x3x128xf32, #tpu.memory_space<vmem>>) attributes {dimension_semantics = [#tpu.dimension_semantics<parallel>, #tpu.dimension_semantics<arbitrary>], iteration_bounds = array<i64: 2, 1>, scalar_prefetch = 0 : i64, scratch_operands = 0 : i64, tpu.core_type = #tpu.core_type<tc>, window_params = [{transform_indices = @transform_0, window_bounds = array<i64: 3, 128>}, {transform_indices = @transform_1, window_bounds = array<i64: 1, 128>}, {pipeline_mode = #tpu.pipeline_mode<synchronous>, transform_indices = @transform_2, window_bounds = array<i64: 3, 1>}, {transform_indices = @transform_3, window_bounds = array<i64: 1, 3, 128>}]} {
    %c0_i32 = arith.constant 0 : i32
    %0 = arith.cmpi eq, %arg1, %c0_i32 : i32
    %1 = arith.extui %0 : i1 to i32
    %c0_i32_0 = arith.constant 0 : i32
    %2 = arith.cmpi ne, %1, %c0_i32_0 : i32
    scf.if %2 {
      %cst_12 = arith.constant 0.000000e+00 : f32
      %19 = vector.broadcast %cst_12 : f32 to vector<1x3x128xf32>
      %c0_13 = arith.constant 0 : index
      %c0_14 = arith.constant 0 : index
      %c0_15 = arith.constant 0 : index
      %20 = vector.load %arg5[%c0_13, %c0_14, %c0_15] : memref<1x3x128xf32, #tpu.memory_space<vmem>>, vector<1x3x128xf32>
      tpu.vector_store %arg5[%c0_13, %c0_14, %c0_15], %19 {strides = array<i32>} : memref<1x3x128xf32, #tpu.memory_space<vmem>>, vector<1x3x128xf32>,
    } else {
    }
    %c0 = arith.constant 0 : index
    %c0_1 = arith.constant 0 : index
    %3 = vector.load %arg2[%c0, %c0_1] : memref<3x128xf32, #tpu.memory_space<vmem>>, vector<3x128xf32>
    %c0_2 = arith.constant 0 : index
    %c0_3 = arith.constant 0 : index
    %4 = vector.load %arg3[%c0_2, %c0_3] : memref<1x128xf32, #tpu.memory_space<vmem>>, vector<1x128xf32>
    %c0_4 = arith.constant 0 : index
    %c0_5 = arith.constant 0 : index
    %5 = vector.load %arg4[%c0_4, %c0_5] : memref<3x1xf32, #tpu.memory_space<vmem>>, vector<3x1xf32>
    %6 = vector.broadcast %4 : vector<1x128xf32> to vector<3x128xf32>
    %7 = arith.subf %6, %3 : vector<3x128xf32>
    %cst = arith.constant 1.000000e+00 : f32
    %8 = vector.broadcast %cst : f32 to vector<3x1xf32>
    %9 = arith.subf %5, %8 : vector<3x1xf32>
    %10 = vector.broadcast %9 : vector<3x1xf32> to vector<3x128xf32>
    %11 = arith.mulf %10, %7 : vector<3x128xf32>
    %12 = vector.broadcast %5 : vector<3x1xf32> to vector<3x128xf32>
    %13 = arith.mulf %12, %7 : vector<3x128xf32>
    %14 = arith.maximumf %11, %13 : vector<3x128xf32>
    %c0_6 = arith.constant 0 : index
    %c0_7 = arith.constant 0 : index
    %c0_8 = arith.constant 0 : index
    %15 = vector.load %arg5[%c0_6, %c0_7, %c0_8] : memref<1x3x128xf32, #tpu.memory_space<vmem>>, vector<1x3x128xf32>
    %16 = vector.shape_cast %14 : vector<3x128xf32> to vector<1x3x128xf32>
    %17 = arith.addf %15, %16 : vector<1x3x128xf32>
    %c0_9 = arith.constant 0 : index
    %c0_10 = arith.constant 0 : index
    %c0_11 = arith.constant 0 : index
    %18 = vector.load %arg5[%c0_9, %c0_10, %c0_11] : memref<1x3x128xf32, #tpu.memory_space<vmem>>, vector<1x3x128xf32>
    tpu.vector_store %arg5[%c0_9, %c0_10, %c0_11], %17 {strides = array<i32>} : memref<1x3x128xf32, #tpu.memory_space<vmem>>, vector<1x3x128xf32>,
    return
  }
  func.func @transform_0(%arg0: i32, %arg1: i32) -> (i32, i32) {
    %c1_i32 = arith.constant 1 : i32
    %0 = arith.muli %arg0, %c1_i32 : i32
    %1 = arith.addi %0, %arg1 : i32
    %c0_i32 = arith.constant 0 : i32
    %c0_i32_0 = arith.constant 0 : i32
    return %c0_i32, %1 : i32, i32
  }
  func.func @transform_1(%arg0: i32, %arg1: i32) -> (i32, i32) {
    %c1_i32 = arith.constant 1 : i32
    %0 = arith.muli %arg0, %c1_i32 : i32
    %1 = arith.addi %0, %arg1 : i32
    %c0_i32 = arith.constant 0 : i32
    %c0_i32_0 = arith.constant 0 : i32
    return %c0_i32, %1 : i32, i32
  }
  func.func @transform_2(%arg0: i32, %arg1: i32) -> (i32, i32) {
    %c0_i32 = arith.constant 0 : i32
    %c0_i32_0 = arith.constant 0 : i32
    %c0_i32_1 = arith.constant 0 : i32
    return %c0_i32, %c0_i32_0 : i32, i32
  }
  func.func @transform_3(%arg0: i32, %arg1: i32) -> (i32, i32, i32) {
    %c0_i32 = arith.constant 0 : i32
    %c0_i32_0 = arith.constant 0 : i32
    %c0_i32_1 = arith.constant 0 : i32
    return %arg0, %c0_i32, %c0_i32_0 : i32, i32, i32
  }
}

</mosaic_0001>

<bundles_post_ra>
// kernel: tpu_custom_call.1
= control target key start
LH: loop header
LB: loop body
LE: loop exit
PB: predicated region body
PF: predicated region fallthrough
CT: control target
= control target key end

     0   :  { %8 = vsyncpa [#allocation3], 0  ;;  %s606_s0 = inlined_call_operand.hbm [shape: f32[3,256], index: 0, kind: input, shape index: {}]   ;;  %s607_s1 = inlined_call_operand.vmem [shape: f32[1,256], index: 1, kind: input, shape index: {}]   ;;  %s608_s2 = inlined_call_operand.vmem [shape: f32[3,1], index: 2, kind: input, shape index: {}]   ;;  %s609_s3 = inlined_call_operand.vmem [shape: f32[2,3,128], index: 3, kind: output, shape index: {}]  }
   0x1   :  { %10 = vsyncpa [#allocation3 + $0x1], 0  ;;  %s512_s12 = smov 0   ;;  %s514_s13 = smov 0  }
   0x2   :  { %s516_s14 = smov 0   ;;  %s518_s15 = smov 0  }
   0x3   :  { %s520_s16 = smov 0   ;;  %s522_s17 = smov 0  }
   0x4 LB: > { %s337_s18 = sadd.s32 4294967295, %s488_s17   ;;  %s28_s19 = sadd.s32 1, %s484_s16  ;;  %s488_s17 = sphi %s522_s17, %s16_s17   ;;  %s484_s16 = sphi %s520_s16, %s616_s16   ;;  %s480_s15 = sphi %s518_s15, %s615_s15   ;;  %s476_s14 = sphi %s516_s14, %s614_s14   ;;  %s472_s13 = sphi %s514_s13, %s613_s13   ;;  %s468_s12 = sphi %s512_s12, %s612_s12  }
   0x5   : > { %p30_p0 = scmp.ge.s32.totalorder %s28_s19, 2  ;;  %s37_s20 = sadd.s32 1, %s476_s14 }
   0x6   : > { %p44_p1 = scmp.ne.s32.totalorder %s476_s14, %s472_s13  ;;  %p45_p2 = scmp.eq.s32.totalorder %s488_s17, 0 }
   0x7   : > { %s618_s19 = smov (%p30_p0, %s28_s19), 0  ;;  %p50_p4 = scmp.ne.s32.totalorder %s472_s13, %s468_s12 }
   0x8   : > { %p548_p3 = por %p45_p2, %p44_p1  ;;  %s34_s22 = ssub.s32 %s484_s16, %s618_s19 }
   0x9   : > { %p51_p5 = scmp.eq.s32.totalorder %s337_s18, 0  ;;  %p35_p6 = scmp.eq.s32.totalorder %s34_s22, 0 }
   0xa   : > { %p355_p8 = scmp.lt.s32.totalorder %s488_s17, 2  ;;  %s152_s25 = sand.u32 1, %s476_s14  }
   0xb   : > { %p555_p7 = por %p51_p5, %p50_p4  ;;  %s342_s26 = sshll.u32 %s484_s16, 2 }
   0xc   : > { %s561_s24 = scalar_select %p35_p6, %s476_s14, %s37_s20  }
   0xd   : > { %s341_s27 = sshll.u32 %s152_s25, 2  ;;  %s161_s30 = scalar_lea.hbm %s606_s0, %s342_s26 }
   0xe   : > { %s163_s4 = sshll.u32 %s161_s30, 4  ;;  %s156_s5 = scalar_lea.vmem [#allocation2], %s341_s27  ;;  %s164_s4 = int_to_ptr.hbm [resolvable:$true] %s163_s4 }
   0xf   : > { %s165_s6 = sshll.u32 %s156_s5, 4  ;;  %p352_p9 = pnand %p355_p8, %p548_p3  ;;  %s166_s6 = int_to_ptr.vmem [resolvable:$true] %s165_s6 }
  0x10   : > { %p343_p10 = scmp.ge.s32.totalorder %s488_s17, 1  ;;  %p178_p11 = scmp.lt.s32.totalorder %s488_s17, 3 }
  0x11   : > { %s153_s7 = scalar_lea.sflag [#allocation3], %s152_s25 }
  0x12   : > { %354 = dma.hbm_to_vmem [thread:$0]  (!%p352_p9), %s164_s4, 64, %s166_s6, %s153_s7  }
  0x13   : > { %p179_p12 = pnand %p343_p10, %p178_p11 }
  0x14   : > { %s184_s8 = sand.u32 (!%p179_p12), 1, %s472_s13  }
  0x15   : > { %182 = sbr.rel (%p179_p12) target bundleno = 160 (0xa0), region = 32  ;;  %s344_s9 = sshll.u32 (!%p179_p12), %s184_s8, 2 }
  0x16   : > { %s185_s10 = scalar_lea.sflag (!%p179_p12), [#allocation3], %s184_s8  ;;  %s188_s11 = scalar_lea.vmem (!%p179_p12), [#allocation2], %s344_s9 }
  0x1a   : > { %463 = dma.done.wait (%p555_p7), %s185_s10, 64  }
  0x1b   : > { %465 = vsyncadd (%p555_p7), %s185_s10, 4294967232  ;;  %p217_p13 = scmp.lt.s32.totalorder %s480_s15, 1  ;;  %v490_v0 = vmov 0   ;;  %v232_v1 = vld [vmem:[%s608_s2] sm:$0x7]  ;;  %v491_v3 = vmov 0.0  }
  0x1c   : > { %406 = vset.pattern.permute.xlu0 %v490_v0  ;;  %v346_v2 = vadd.f32 -1.0, %v232_v1  ;;  %v230_v6 = vld [vmem:[%s188_s11] sm:$0x7] }
  0x1d   : > { %s620_s15 = smov (!%p217_p13, %s480_s15), 1 }
  0x1e   : > { %s219_s20 = scalar_lea.vmem %s607_s1, %s620_s15  ;;  %240 = vperm.xlu0 %406, %v346_v2   ;;  %s345_s25 = sshll.u32 %s620_s15, 2 }
  0x1f   : > { %s224_s27 = scalar_lea.vmem %s609_s3, %s345_s25  ;;  %v407_v5 = vld [vmem:[%s219_s20] ss:$0 sm:$0xff] }
  0x20   : > { %229 = vst [vmem:[%s224_s27] sm:$0x7] %v491_v3  ;;  %v236_v7 = vsub.f32 %v407_v5, %v230_v6 }
  0x26   : > { %246 = vperm.xlu0 %406, %v232_v1  }
  0x27   : > { %v251_v11 = vld [vmem:[%s224_s27] sm:$0x7] }
  0x90   : > { %v241_v4 = vpop.permute.xlu0 %240 }
  0x91   : > { %v243_v9 = vmul.f32 %v241_v4, %v236_v7 }
  0x98   : > { %v247_v8 = vpop.permute.xlu0 %246 }
  0x99   : > { %v249_v10 = vmul.f32 %v247_v8, %v236_v7 }
  0x9b   : > { %v250_v12 = vmax.f32 %v243_v9, %v249_v10 }
  0x9d   : > { %v252_v13 = vadd.f32 %v251_v11, %v250_v12 }
  0x9f   : > { %253 = vst [vmem:[%s224_s27] sm:$0x7] %v252_v13 }
  0xa0 PF: > { %s16_s17 = sadd.s32 1, %s488_s17   ;;  %s612_s12 = smov %s472_s13 }
  0xa1   : > { %p13_p0 = scmp.ge.s32.totalorder %s16_s17, 4   ;;  %s613_s13 = smov %s476_s14 }
  0xa2   : > { %s614_s14 = smov %s561_s24  ;;  %s615_s15 = smov %s484_s16 }
  0xa3   : > { %s616_s16 = smov %s618_s19  ;;  %15 = sbr.rel (!%p13_p0) target bundleno = 4 (0x4), region = 79 }
  0xa8   :  { %273 = vsyncpa [#allocation3], 1 }
  0xa9   :  { %275 = vsyncpa [#allocation3 + $0x1], 1 }

</bundles_post_ra>
